<compile_context>
chip_gen: v7x
topology: tpu7x:2x2x1
jax: 0.10.0
libtpu: 0.0.40
codegen_flags: <defaults>
</compile_context>

<pallas_src>
import functools

import jax
import jax.numpy as jnp
from jax.experimental import pallas as pl
from jax.experimental.pallas import tpu as pltpu

FOLD = 4  # batch rows folded into the lane dim (FOLD * emb_size == 128 lanes)


def _round_up(n, m):
    return ((n + m - 1) // m) * m


def _gate_multi_kernel(xe_ref, xn_ref, xt_ref, we_ref, wn_ref, wt_ref, b_ref,
                       out_ref, *, fold_emb):
    """Fused forward on lane-dense (folded-batch) tiles.

    xe/xn/xt : [TR, 4E] / [TR, 4N] / [TR, 4T]      folded activations
    we/wn/wt : [4E, 8E] / [4N, 8E] / [4T, 8E]      block-diagonal packed weights
    b        : [1, 8E]                              (g bias | gate bias) x FOLD
    out      : [TR, 4E]
    """
    # Three MXU pushes accumulated in f32 (MXU is nowhere near the bottleneck).
    lin = jnp.dot(xe_ref[...], we_ref[...], preferred_element_type=jnp.float32)
    lin = lin + jnp.dot(xn_ref[...], wn_ref[...], preferred_element_type=jnp.float32)
    lin = lin + jnp.dot(xt_ref[...], wt_ref[...], preferred_element_type=jnp.float32)
    lin = lin + b_ref[...]
    g_embedded = jnp.tanh(lin[:, :fold_emb])         # lanes 0..127   (vreg aligned)
    gate = jax.nn.sigmoid(lin[:, fold_emb:])         # lanes 128..255 (vreg aligned)
    x_ent = xe_ref[...].astype(jnp.float32)
    # (1 - gate) * x + gate * g  ==  x + gate * (g - x)
    out_ref[...] = (x_ent + gate * (g_embedded - x_ent)).astype(out_ref.dtype)


def pack_gate_multi_params(params, *, fold=FOLD, weights_dtype=jnp.float32):
    """One-time (init-time) repack of the 6 weight matrices + 2 biases into the
    lane-dense block-diagonal layout the kernel consumes."""
    wg_e, wg_n, wg_t, b_g, w_e, w_n, w_t, gate_bias = params
    eye = jnp.eye(fold, dtype=jnp.float32)

    def blkdiag(w):                                   # (in, E) -> (fold*in, fold*E)
        return jnp.kron(eye, w.astype(jnp.float32))

    w_ent = jnp.concatenate([blkdiag(wg_e), blkdiag(w_e)], 1).astype(weights_dtype)
    w_num = jnp.concatenate([blkdiag(wg_n), blkdiag(w_n)], 1).astype(weights_dtype)
    w_txt = jnp.concatenate([blkdiag(wg_t), blkdiag(w_t)], 1).astype(weights_dtype)
    bias = jnp.concatenate([jnp.tile(b_g, fold), jnp.tile(gate_bias, fold)])
    bias = bias.reshape(1, -1).astype(jnp.float32)    # bias stays f32 (tiny)
    return w_ent, w_num, w_txt, bias


def gate_multi(x_ent, x_lit_num, x_lit_txt, packed_params, *, block_batch=8192,
               input_dtype=None):
    """GateMulti forward.  `packed_params` comes from pack_gate_multi_params."""
    w_ent, w_num, w_txt, bias = packed_params
    fold = FOLD
    B, E = x_ent.shape
    N = x_lit_num.shape[1]
    T = x_lit_txt.shape[1]
    out_dtype = x_ent.dtype

    if input_dtype is not None:                       # e.g. bf16 on v6e/v7x
        x_ent = x_ent.astype(input_dtype)
        x_lit_num = x_lit_num.astype(input_dtype)
        x_lit_txt = x_lit_txt.astype(input_dtype)

    # Fold FOLD consecutive batch rows into lanes: (B, E) -> (B/FOLD, FOLD*E).
    # For B % FOLD == 0 (and B >= 32) these reshapes are free row-major
    # bitcasts; only a tiny ragged/micro-batch tail ever needs a pad.
    B4 = _round_up(B, fold)
    R = B4 // fold
    if R < 8:                                         # tiny batch: one full sublane
        R = 8
        B4 = R * fold
    if B4 != B:
        pad = ((0, B4 - B), (0, 0))
        x_ent = jnp.pad(x_ent, pad)
        x_lit_num = jnp.pad(x_lit_num, pad)
        x_lit_txt = jnp.pad(x_lit_txt, pad)
    xe = x_ent.reshape(R, fold * E)
    xn = x_lit_num.reshape(R, fold * N)
    xt = x_lit_txt.reshape(R, fold * T)

    # Batch tiling (in folded rows).  Large tiles amortize the ~0.35us/step
    # overhead; cap so the "parallel" axis keeps >= 2 steps (v7x: 2 TCs).
    # Ragged last tiles are masked by Pallas -> no pad-to-tile / out[:B] copies.
    max_rows = max(8, (block_batch // (fold * 8)) * 8)
    if R <= max_rows:
        TR = _round_up(pl.cdiv(R, 2), 8)              # >= 8, 2 grid steps when R > 8
    else:
        TR = max_rows
    grid = (pl.cdiv(R, TR),)

    act_bytes = xe.dtype.itemsize
    cost = pl.CostEstimate(
        flops=2 * B * (E + N + T) * (2 * E),
        transcendentals=2 * B * E,
        bytes_accessed=B * (2 * E + N + T) * act_bytes
        + (w_ent.size + w_num.size + w_txt.size) * w_ent.dtype.itemsize,
    )

    out = pl.pallas_call(
        functools.partial(_gate_multi_kernel, fold_emb=fold * E),
        out_shape=jax.ShapeDtypeStruct((R, fold * E), out_dtype),
        grid=grid,
        in_specs=[
            pl.BlockSpec((TR, fold * E), lambda i: (i, 0)),            # x_ent  (tiled)
            pl.BlockSpec((TR, fold * N), lambda i: (i, 0)),            # x_num  (tiled)
            pl.BlockSpec((TR, fold * T), lambda i: (i, 0)),            # x_txt  (tiled)
            pl.BlockSpec((fold * E, 2 * fold * E), lambda i: (0, 0)),  # weights:
            pl.BlockSpec((fold * N, 2 * fold * E), lambda i: (0, 0)),  #  VMEM-resident
            pl.BlockSpec((fold * T, 2 * fold * E), lambda i: (0, 0)),
            pl.BlockSpec((1, 2 * fold * E), lambda i: (0, 0)),         # bias
        ],
        out_specs=pl.BlockSpec((TR, fold * E), lambda i: (i, 0)),
        compiler_params=pltpu.CompilerParams(
            dimension_semantics=("parallel",)),
        cost_estimate=cost,
    )(xe, xn, xt, w_ent, w_num, w_txt, bias)

    out = out.reshape(B4, E)                          # free reshape
    return out if B4 == B else out[:B]


def reference(x_ent, x_lit_num, x_lit_txt, params):
    wg_e, wg_n, wg_t, b_g, w_e, w_n, w_t, gate_bias = params
    g_emb = jnp.tanh(x_ent @ wg_e + x_lit_num @ wg_n + x_lit_txt @ wg_t + b_g)
    gate = jax.nn.sigmoid(x_ent @ w_e + x_lit_num @ w_n + x_lit_txt @ w_t + gate_bias)
    return (1.0 - gate) * x_ent + gate * g_emb


if __name__ == "__main__":
    emb_size, num_lit_size, txt_lit_size = 32, 16, 16
    batch = 8

    key = jax.random.PRNGKey(0)
    keys = jax.random.split(key, 10)

    # Deterministic synthetic parameters (weights stored [in, out]).
    scale = 0.1
    wg_e = scale * jax.random.normal(keys[0], (emb_size, emb_size), jnp.float32)
    wg_n = scale * jax.random.normal(keys[1], (num_lit_size, emb_size), jnp.float32)
    wg_t = scale * jax.random.normal(keys[2], (txt_lit_size, emb_size), jnp.float32)
    b_g = scale * jax.random.normal(keys[3], (emb_size,), jnp.float32)
    w_e = scale * jax.random.normal(keys[4], (emb_size, emb_size), jnp.float32)
    w_n = scale * jax.random.normal(keys[5], (num_lit_size, emb_size), jnp.float32)
    w_t = scale * jax.random.normal(keys[6], (txt_lit_size, emb_size), jnp.float32)
    gate_bias = jnp.zeros((emb_size,), jnp.float32)   # nn.Parameter(torch.zeros(E))
    params = (wg_e, wg_n, wg_t, b_g, w_e, w_n, w_t, gate_bias)
    packed = pack_gate_multi_params(params)

    # Deterministic example inputs (small shapes).
    x_ent = jax.random.normal(keys[7], (batch, emb_size), jnp.float32)
    x_lit_num = jax.random.normal(keys[8], (batch, num_lit_size), jnp.float32)
    x_lit_txt = jax.random.normal(keys[9], (batch, txt_lit_size), jnp.float32)

    out = jax.block_until_ready(gate_multi(x_ent, x_lit_num, x_lit_txt, packed))
    ref = reference(x_ent, x_lit_num, x_lit_txt, params)
    assert out.shape == (batch, emb_size)
    assert jnp.allclose(out, ref, atol=1e-5, rtol=1e-5)

    # Multi-tile path with a ragged (Pallas-masked) last tile, B % 4 == 0.
    kb = jax.random.split(jax.random.PRNGKey(1), 3)
    big_B = 1000
    xe_b = jax.random.normal(kb[0], (big_B, emb_size), jnp.float32)
    xn_b = jax.random.normal(kb[1], (big_B, num_lit_size), jnp.float32)
    xt_b = jax.random.normal(kb[2], (big_B, txt_lit_size), jnp.float32)
    out_big = jax.block_until_ready(
        gate_multi(xe_b, xn_b, xt_b, packed, block_batch=512))
    assert out_big.shape == (big_B, emb_size)
    assert jnp.allclose(out_big, reference(xe_b, xn_b, xt_b, params),
                        atol=1e-5, rtol=1e-5)

    # Ragged-tail path (B % 4 != 0 -> only a <4-row pad in the wrapper).
    out_tail = jax.block_until_ready(
        gate_multi(xe_b[:997], xn_b[:997], xt_b[:997], packed))
    assert out_tail.shape == (997, emb_size)
    assert jnp.allclose(out_tail,
                        reference(xe_b[:997], xn_b[:997], xt_b[:997], params),
                        atol=1e-5, rtol=1e-5)

    # Optional bf16 activation/weight path (v6e/v7x: halves HBM read traffic).
    packed_bf16 = pack_gate_multi_params(params, weights_dtype=jnp.bfloat16)
    out_bf16 = jax.block_until_ready(
        gate_multi(xe_b, xn_b, xt_b, packed_bf16, input_dtype=jnp.bfloat16))
    assert out_bf16.shape == (big_B, emb_size)
    assert jnp.allclose(out_bf16, reference(xe_b, xn_b, xt_b, params),
                        atol=1e-1, rtol=1e-1)

    print("KERNEL_OK")
</pallas_src>

<mosaic_0001>
module attributes {stable_mosaic.version = 11 : i64} {
  func.func @_gate_multi_kernel(%arg0: i32, %arg1: memref<8x128xf32, #tpu.memory_space<vmem>>, %arg2: memref<8x64xf32, #tpu.memory_space<vmem>>, %arg3: memref<8x64xf32, #tpu.memory_space<vmem>>, %arg4: memref<128x256xf32, #tpu.memory_space<vmem>>, %arg5: memref<64x256xf32, #tpu.memory_space<vmem>>, %arg6: memref<64x256xf32, #tpu.memory_space<vmem>>, %arg7: memref<1x256xf32, #tpu.memory_space<vmem>>, %arg8: memref<8x128xf32, #tpu.memory_space<vmem>>) attributes {dimension_semantics = [#tpu.dimension_semantics<parallel>], iteration_bounds = array<i64: 1>, scalar_prefetch = 0 : i64, scratch_operands = 0 : i64, tpu.core_type = #tpu.core_type<tc>, window_params = [{transform_indices = @transform_0, window_bounds = array<i64: 8, 128>}, {transform_indices = @transform_1, window_bounds = array<i64: 8, 64>}, {transform_indices = @transform_2, window_bounds = array<i64: 8, 64>}, {pipeline_mode = #tpu.pipeline_mode<synchronous>, transform_indices = @transform_3, window_bounds = array<i64: 128, 256>}, {pipeline_mode = #tpu.pipeline_mode<synchronous>, transform_indices = @transform_4, window_bounds = array<i64: 64, 256>}, {pipeline_mode = #tpu.pipeline_mode<synchronous>, transform_indices = @transform_5, window_bounds = array<i64: 64, 256>}, {pipeline_mode = #tpu.pipeline_mode<synchronous>, transform_indices = @transform_6, window_bounds = array<i64: 1, 256>}, {transform_indices = @transform_7, window_bounds = array<i64: 8, 128>}]} {
    %c0 = arith.constant 0 : index
    %c0_0 = arith.constant 0 : index
    %0 = vector.load %arg1[%c0, %c0_0] : memref<8x128xf32, #tpu.memory_space<vmem>>, vector<8x128xf32>
    %c0_1 = arith.constant 0 : index
    %c0_2 = arith.constant 0 : index
    %1 = vector.load %arg4[%c0_1, %c0_2] : memref<128x256xf32, #tpu.memory_space<vmem>>, vector<128x256xf32>
    %cst = arith.constant dense<0.000000e+00> : vector<8x256xf32>
    %2 = tpu.matmul %0, %1, %cst {dimension_numbers = #tpu.dot_dimension_numbers<[1], [0], [0], [1], [0, 0, 1, 1], [], []>} : vector<8x128xf32>, vector<128x256xf32>, vector<8x256xf32> -> vector<8x256xf32>
    %c0_3 = arith.constant 0 : index
    %c0_4 = arith.constant 0 : index
    %3 = vector.load %arg2[%c0_3, %c0_4] : memref<8x64xf32, #tpu.memory_space<vmem>>, vector<8x64xf32>
    %c0_5 = arith.constant 0 : index
    %c0_6 = arith.constant 0 : index
    %4 = vector.load %arg5[%c0_5, %c0_6] : memref<64x256xf32, #tpu.memory_space<vmem>>, vector<64x256xf32>
    %cst_7 = arith.constant dense<0.000000e+00> : vector<8x256xf32>
    %5 = tpu.matmul %3, %4, %cst_7 {dimension_numbers = #tpu.dot_dimension_numbers<[1], [0], [0], [1], [0, 0, 1, 1], [], []>} : vector<8x64xf32>, vector<64x256xf32>, vector<8x256xf32> -> vector<8x256xf32>
    %6 = arith.addf %2, %5 : vector<8x256xf32>
    %c0_8 = arith.constant 0 : index
    %c0_9 = arith.constant 0 : index
    %7 = vector.load %arg3[%c0_8, %c0_9] : memref<8x64xf32, #tpu.memory_space<vmem>>, vector<8x64xf32>
    %c0_10 = arith.constant 0 : index
    %c0_11 = arith.constant 0 : index
    %8 = vector.load %arg6[%c0_10, %c0_11] : memref<64x256xf32, #tpu.memory_space<vmem>>, vector<64x256xf32>
    %cst_12 = arith.constant dense<0.000000e+00> : vector<8x256xf32>
    %9 = tpu.matmul %7, %8, %cst_12 {dimension_numbers = #tpu.dot_dimension_numbers<[1], [0], [0], [1], [0, 0, 1, 1], [], []>} : vector<8x64xf32>, vector<64x256xf32>, vector<8x256xf32> -> vector<8x256xf32>
    %10 = arith.addf %6, %9 : vector<8x256xf32>
    %c0_13 = arith.constant 0 : index
    %c0_14 = arith.constant 0 : index
    %11 = vector.load %arg7[%c0_13, %c0_14] : memref<1x256xf32, #tpu.memory_space<vmem>>, vector<1x256xf32>
    %12 = vector.broadcast %11 : vector<1x256xf32> to vector<8x256xf32>
    %13 = arith.addf %10, %12 : vector<8x256xf32>
    %14 = vector.extract_strided_slice %13 {offsets = [0, 0], sizes = [8, 128], strides = [1, 1]} : vector<8x256xf32> to vector<8x128xf32>
    %15 = math.tanh %14 : vector<8x128xf32>
    %16 = vector.extract_strided_slice %13 {offsets = [0, 128], sizes = [8, 128], strides = [1, 1]} : vector<8x256xf32> to vector<8x128xf32>
    %17 = arith.negf %16 : vector<8x128xf32>
    %18 = math.exp %17 : vector<8x128xf32>
    %cst_15 = arith.constant 1.000000e+00 : f32
    %19 = vector.broadcast %cst_15 : f32 to vector<8x128xf32>
    %20 = arith.addf %19, %18 : vector<8x128xf32>
    %21 = arith.divf %19, %20 : vector<8x128xf32>
    %c0_16 = arith.constant 0 : index
    %c0_17 = arith.constant 0 : index
    %22 = vector.load %arg1[%c0_16, %c0_17] : memref<8x128xf32, #tpu.memory_space<vmem>>, vector<8x128xf32>
    %23 = arith.subf %15, %22 : vector<8x128xf32>
    %24 = arith.mulf %21, %23 : vector<8x128xf32>
    %25 = arith.addf %22, %24 : vector<8x128xf32>
    %c0_18 = arith.constant 0 : index
    %c0_19 = arith.constant 0 : index
    %26 = vector.load %arg8[%c0_18, %c0_19] : memref<8x128xf32, #tpu.memory_space<vmem>>, vector<8x128xf32>
    tpu.vector_store %arg8[%c0_18, %c0_19], %25 {strides = array<i32>} : memref<8x128xf32, #tpu.memory_space<vmem>>, vector<8x128xf32>,
    return
  }
  func.func @transform_0(%arg0: i32) -> (i32, i32) {
    %c0_i32 = arith.constant 0 : i32
    %c0_i32_0 = arith.constant 0 : i32
    return %arg0, %c0_i32 : i32, i32
  }
  func.func @transform_1(%arg0: i32) -> (i32, i32) {
    %c0_i32 = arith.constant 0 : i32
    %c0_i32_0 = arith.constant 0 : i32
    return %arg0, %c0_i32 : i32, i32
  }
  func.func @transform_2(%arg0: i32) -> (i32, i32) {
    %c0_i32 = arith.constant 0 : i32
    %c0_i32_0 = arith.constant 0 : i32
    return %arg0, %c0_i32 : i32, i32
  }
  func.func @transform_3(%arg0: i32) -> (i32, i32) {
    %c0_i32 = arith.constant 0 : i32
    %c0_i32_0 = arith.constant 0 : i32
    %c0_i32_1 = arith.constant 0 : i32
    return %c0_i32, %c0_i32_0 : i32, i32
  }
  func.func @transform_4(%arg0: i32) -> (i32, i32) {
    %c0_i32 = arith.constant 0 : i32
    %c0_i32_0 = arith.constant 0 : i32
    %c0_i32_1 = arith.constant 0 : i32
    return %c0_i32, %c0_i32_0 : i32, i32
  }
  func.func @transform_5(%arg0: i32) -> (i32, i32) {
    %c0_i32 = arith.constant 0 : i32
    %c0_i32_0 = arith.constant 0 : i32
    %c0_i32_1 = arith.constant 0 : i32
    return %c0_i32, %c0_i32_0 : i32, i32
  }
  func.func @transform_6(%arg0: i32) -> (i32, i32) {
    %c0_i32 = arith.constant 0 : i32
    %c0_i32_0 = arith.constant 0 : i32
    %c0_i32_1 = arith.constant 0 : i32
    return %c0_i32, %c0_i32_0 : i32, i32
  }
  func.func @transform_7(%arg0: i32) -> (i32, i32) {
    %c0_i32 = arith.constant 0 : i32
    %c0_i32_0 = arith.constant 0 : i32
    return %arg0, %c0_i32 : i32, i32
  }
}

</mosaic_0001>

<bundles_post_ra>
// kernel: tpu_custom_call.1
= control target key start
LH: loop header
LB: loop body
LE: loop exit
PB: predicated region body
PF: predicated region fallthrough
CT: control target
= control target key end

     0   :  { %12 = vsyncpa [#allocation3], 0  ;;  %s851_s0 = inlined_call_operand.hbm [shape: f32[8,128], index: 0, kind: input, shape index: {}]   ;;  %s852_s1 = inlined_call_operand.hbm [shape: f32[8,64], index: 1, kind: input, shape index: {}]   ;;  %s853_s2 = inlined_call_operand.hbm [shape: f32[8,64], index: 2, kind: input, shape index: {}]   ;;  %s854_s3 = inlined_call_operand.hbm [shape: f32[128,256], index: 3, kind: input, shape index: {}]   ;;  %s855_s4 = inlined_call_operand.hbm [shape: f32[64,256], index: 4, kind: input, shape index: {}]   ;;  %s856_s5 = inlined_call_operand.hbm [shape: f32[64,256], index: 5, kind: input, shape index: {}]   ;;  %s857_s6 = inlined_call_operand.vmem [shape: f32[1,256], index: 6, kind: input, shape index: {}]   ;;  %s858_s7 = inlined_call_operand.hbm [shape: f32[8,128], index: 7, kind: output, shape index: {}]  }
   0x1   :  { %13 = vsyncpa [#allocation6], 0 }
   0x2   :  { %14 = vsyncpa [#allocation9], 0 }
   0x3   :  { %15 = vsyncpa [#allocation12], 0 }
   0x4   :  { %16 = vsyncpa [#allocation4], 0  ;;  %s686_s24 = smov [#allocation5]   ;;  %s687_s26 = smov [#allocation8]  }
   0x5   :  { %s33_s25 = sshll.u32 %s686_s24, 4  ;;  %s52_s27 = sshll.u32 %s687_s26, 4  ;;  %s34_s25 = int_to_ptr.vmem [resolvable:$true] %s33_s25  ;;  %s736_s27 = int_to_ptr.vmem [resolvable:$true] %s52_s27 }
   0x6   :  { %s522_s30 = scalar_lea.hbm %s852_s1, 128 }
   0x7   :  { %p523_p0 = scmp.ne.s32.totalorder %s852_s1, %s522_s30  ;;  %p526_p1 = scmp.lt.u32.totalorder %s522_s30, %s852_s1 }
   0x9   :  { %p528_p2 = pnand %p526_p1, %p523_p0 }
   0xb   :  { %531 = shalt.err (!%p528_p2)
}
   0xc   :  { %s532_s12 = scalar_lea.vmem %s34_s25, 128  ;;  %p537_p4 = scmp.lt.s32.totalorder %s34_s25, %s34_s25 }
   0xd   :  { %p533_p3 = scmp.ne.s32.totalorder %s34_s25, %s532_s12  ;;  %p538_p5 = scmp.lt.s32.totalorder %s532_s12, %s532_s12 }
   0xf   :  { %p539_p6 = por %p538_p5, %p537_p4 }
  0x11   :  { %p540_p7 = pnand %p539_p6, %p533_p3 }
  0x13   :  { %543 = shalt.err (!%p540_p7)
}
  0x14   :  { %36 = dma.hbm_to_vmem [thread:$0]  %s852_s1, 128, %s34_s25, [#allocation6]  }
  0x15   :  { %s544_s17 = scalar_lea.hbm %s854_s3, 4096 }
  0x16   :  { %p545_p8 = scmp.ne.s32.totalorder %s854_s3, %s544_s17  ;;  %p548_p9 = scmp.lt.u32.totalorder %s544_s17, %s854_s3 }
  0x18   :  { %p550_p10 = pnand %p548_p9, %p545_p8 }
  0x1a   :  { %553 = shalt.err (!%p550_p10)
}
  0x1b   :  { %s554_s22 = scalar_lea.vmem %s736_s27, 4096  ;;  %p559_p12 = scmp.lt.s32.totalorder %s736_s27, %s736_s27 }
  0x1c   :  { %p555_p11 = scmp.ne.s32.totalorder %s736_s27, %s554_s22  ;;  %p560_p13 = scmp.lt.s32.totalorder %s554_s22, %s554_s22 }
  0x1e   :  { %p561_p0 = por %p560_p13, %p559_p12 }
  0x20   :  { %p562_p1 = pnand %p561_p0, %p555_p11 }
  0x22   :  { %565 = shalt.err (!%p562_p1)
}
  0x23   :  { %s688_s1 = smov 256   ;;  %s689_s23 = smov 16  }
  0x24   :  { %58 = dma.hbm_to_vmem [thread:$0]  %s854_s3, 4096, %s736_s27, [#allocation9], %s688_s1, %s688_s1, %s689_s23  }
  0x25   :  { %s690_s26 = smov [#allocation2]   ;;  %s691_s29 = smov [#allocation7]  }
  0x26   :  { %s23_s28 = sshll.u32 %s690_s26, 4  ;;  %s43_s30 = sshll.u32 %s691_s29, 4  ;;  %s24_s28 = int_to_ptr.vmem [resolvable:$true] %s23_s28  ;;  %s44_s30 = int_to_ptr.vmem [resolvable:$true] %s43_s30 }
  0x27   :  { %s566_s10 = scalar_lea.hbm %s851_s0, 128 }
  0x28   :  { %p567_p2 = scmp.ne.s32.totalorder %s851_s0, %s566_s10  ;;  %p570_p3 = scmp.lt.u32.totalorder %s566_s10, %s851_s0 }
  0x2a   :  { %p572_p4 = pnand %p570_p3, %p567_p2 }
  0x2c   :  { %575 = shalt.err (!%p572_p4)
}
  0x2d   :  { %s576_s3 = scalar_lea.vmem %s24_s28, 128  ;;  %p581_p6 = scmp.lt.s32.totalorder %s24_s28, %s24_s28 }
  0x2e   :  { %p577_p5 = scmp.ne.s32.totalorder %s24_s28, %s576_s3  ;;  %p582_p7 = scmp.lt.s32.totalorder %s576_s3, %s576_s3 }
  0x30   :  { %p583_p8 = por %p582_p7, %p581_p6 }
  0x32   :  { %p584_p9 = pnand %p583_p8, %p577_p5 }
  0x34   :  { %587 = shalt.err (!%p584_p9)
}
  0x35   :  { %26 = dma.hbm_to_vmem [thread:$0]  %s851_s0, 128, %s24_s28, [#allocation3]  }
  0x36   :  { %s588_s18 = scalar_lea.hbm %s853_s2, 128 }
  0x37   :  { %p589_p10 = scmp.ne.s32.totalorder %s853_s2, %s588_s18  ;;  %p592_p11 = scmp.lt.u32.totalorder %s588_s18, %s853_s2 }
  0x39   :  { %p594_p12 = pnand %p592_p11, %p589_p10 }
  0x3b   :  { %597 = shalt.err (!%p594_p12)
}
  0x3c   :  { %s598_s24 = scalar_lea.vmem %s44_s30, 128  ;;  %p603_p0 = scmp.lt.s32.totalorder %s44_s30, %s44_s30 }
  0x3d   :  { %p599_p13 = scmp.ne.s32.totalorder %s44_s30, %s598_s24  ;;  %p604_p1 = scmp.lt.s32.totalorder %s598_s24, %s598_s24 }
  0x3f   :  { %p605_p2 = por %p604_p1, %p603_p0 }
  0x41   :  { %p606_p3 = pnand %p605_p2, %p599_p13 }
  0x43   :  { %609 = shalt.err (!%p606_p3)
}
  0x44   :  { %46 = dma.hbm_to_vmem [thread:$0]  %s853_s2, 128, %s44_s30, [#allocation6]  }
  0x45   :  { %s692_s26 = smov [#allocation10]   ;;  %s693_s29 = smov [#allocation11]  }
  0x46   :  { %s64_s28 = sshll.u32 %s692_s26, 4  ;;  %s76_s8 = sshll.u32 %s693_s29, 4  ;;  %s65_s28 = int_to_ptr.vmem [resolvable:$true] %s64_s28  ;;  %s794_s8 = int_to_ptr.vmem [resolvable:$true] %s76_s8 }
  0x47   :  { %s610_s11 = scalar_lea.hbm %s855_s4, 2048 }
  0x48   :  { %p611_p4 = scmp.ne.s32.totalorder %s855_s4, %s610_s11  ;;  %p614_p5 = scmp.lt.u32.totalorder %s610_s11, %s855_s4 }
  0x4a   :  { %p616_p6 = pnand %p614_p5, %p611_p4 }
  0x4c   :  { %619 = shalt.err (!%p616_p6)
}
  0x4d   :  { %s620_s2 = scalar_lea.vmem %s65_s28, 2048  ;;  %p625_p8 = scmp.lt.s32.totalorder %s65_s28, %s65_s28 }
  0x4e   :  { %p621_p7 = scmp.ne.s32.totalorder %s65_s28, %s620_s2  ;;  %p626_p9 = scmp.lt.s32.totalorder %s620_s2, %s620_s2 }
  0x50   :  { %p627_p10 = por %p626_p9, %p625_p8 }
  0x52   :  { %p628_p11 = pnand %p627_p10, %p621_p7 }
  0x54   :  { %631 = shalt.err (!%p628_p11)
}
  0x55   :  { %70 = dma.hbm_to_vmem [thread:$0]  %s855_s4, 2048, %s65_s28, [#allocation9], %s688_s1, %s688_s1, %s689_s23  }
  0x56   :  { %s632_s17 = scalar_lea.hbm %s856_s5, 2048 }
  0x57   :  { %p633_p12 = scmp.ne.s32.totalorder %s856_s5, %s632_s17  ;;  %p636_p13 = scmp.lt.u32.totalorder %s632_s17, %s856_s5 }
  0x59   :  { %p638_p0 = pnand %p636_p13, %p633_p12 }
  0x5b   :  { %641 = shalt.err (!%p638_p0)
}
  0x5c   :  { %s642_s22 = scalar_lea.vmem %s794_s8, 2048  ;;  %p647_p2 = scmp.lt.s32.totalorder %s794_s8, %s794_s8 }
  0x5d   :  { %p643_p1 = scmp.ne.s32.totalorder %s794_s8, %s642_s22  ;;  %p648_p3 = scmp.lt.s32.totalorder %s642_s22, %s642_s22 }
  0x5f   :  { %p649_p4 = por %p648_p3, %p647_p2 }
  0x61   :  { %p650_p5 = pnand %p649_p4, %p643_p1 }
  0x63   :  { %653 = shalt.err (!%p650_p5)
}
  0x64   :  { %82 = dma.hbm_to_vmem [thread:$0]  %s856_s5, 2048, %s794_s8, [#allocation12], %s688_s1, %s688_s1, %s689_s23  }
  0x65   :  { %676 = dma.done.wait [#allocation3], 128  }
  0x66   :  { %677 = vsyncadd [#allocation3], 4294967168 }
  0x67   :  { %678 = dma.done.wait [#allocation6], 256  }
  0x68   :  { %679 = vsyncadd [#allocation6], 4294967040 }
  0x69   :  { %680 = dma.done.wait [#allocation9], 6144  }
  0x6a   :  { %681 = vsyncadd [#allocation9], 4294961152 }
  0x6b   :  { %682 = dma.done.wait [#allocation12], 2048  }
  0x6c   :  { %683 = vsyncadd [#allocation12], 4294965248  ;;  %v694_v0 = vmov 0.0   ;;  %v105_v1 = vld [vmem:[#allocation8 + $0x8] sm:$0xff]  ;;  %v107_v2 = vld [vmem:[#allocation8 + $0x18] sm:$0xff]  ;;  %vm153_vm0 = vcmask 523264  }
  0x6d   :  { %221 = vmatprep.mubr.f32.mxu0 %v694_v0  ;;  %292 = vmatprep.mubr.f32.mxu1 %v694_v0  ;;  %v138_v3 = vld [vmem:[#allocation10 + $0x8] sm:$0xff]  ;;  %v454_v4 = vpack.c.bf16 %v107_v2, %v105_v1  ;;  %v140_v5 = vld [vmem:[#allocation10 + $0x18] sm:$0xff]  ;;  %v104_v6 = vld [vmem:[#allocation8] sm:$0xff] }
  0x6e   :  { %v106_v7 = vld [vmem:[#allocation8 + $0x10] sm:$0xff]  ;;  %v438_v8 = vpack.c.bf16 %v140_v5, %v138_v3  ;;  %v137_v10 = vld [vmem:[#allocation10] sm:$0xff]  ;;  %v109_v12 = vld [vmem:[#allocation8 + $0x28] sm:$0xff] }
  0x6f   :  { %v456_v9 = vpack.c.bf16 %v106_v7, %v104_v6  ;;  %v139_v11 = vld [vmem:[#allocation10 + $0x10] sm:$0xff]  ;;  %455 = vmatprep.subr.bf16.mxu1 %v454_v4  ;;  %v111_v14 = vld [vmem:[#allocation8 + $0x38] sm:$0xff]  ;;  %v142_v15 = vld [vmem:[#allocation10 + $0x28] sm:$0xff] }
  0x70   :  { %v440_v13 = vpack.c.bf16 %v139_v11, %v137_v10  ;;  %v144_v16 = vld [vmem:[#allocation10 + $0x38] sm:$0xff]  ;;  %439 = vmatprep.subr.bf16.mxu0 %v438_v8  ;;  %v458_v17 = vpack.c.bf16 %v111_v14, %v109_v12  ;;  %v108_v19 = vld [vmem:[#allocation8 + $0x20] sm:$0xff]  ;;  %v110_v20 = vld [vmem:[#allocation8 + $0x30] sm:$0xff] }
  0x71   :  { %457 = vmatpush1.bf16.msra.mxu1 %v456_v9  ;;  %v442_v18 = vpack.c.bf16 %v144_v16, %v142_v15  ;;  %v141_v21 = vld [vmem:[#allocation10 + $0x20] sm:$0xff]  ;;  %v460_v22 = vpack.c.bf16 %v110_v20, %v108_v19  ;;  %v143_v23 = vld [vmem:[#allocation10 + $0x30] sm:$0xff]  ;;  %v113_v24 = vld [vmem:[#allocation8 + $0x48] sm:$0xff] }
  0x72   :  { %441 = vmatpush1.bf16.msra.mxu0 %v440_v13  ;;  %v115_v25 = vld [vmem:[#allocation8 + $0x58] sm:$0xff]  ;;  %459 = vmatprep.subr.bf16.mxu1 %v458_v17  ;;  %v444_v26 = vpack.c.bf16 %v143_v23, %v141_v21  ;;  %v146_v28 = vld [vmem:[#allocation10 + $0x48] sm:$0xff]  ;;  %v112_v30 = vld [vmem:[#allocation8 + $0x40] sm:$0xff] }
  0x73   :  { %443 = vmatprep.subr.bf16.mxu0 %v442_v18  ;;  %v462_v27 = vpack.c.bf16 %v115_v25, %v113_v24  ;;  %v148_v29 = vld [vmem:[#allocation10 + $0x58] sm:$0xff]  ;;  %v114_v32 = vld [vmem:[#allocation8 + $0x50] sm:$0xff]  ;;  %v145_v33 = vld [vmem:[#allocation10 + $0x40] sm:$0xff] }
  0x74   :  { %v446_v31 = vpack.c.bf16 %v148_v29, %v146_v28  ;;  %v147_v34 = vld [vmem:[#allocation10 + $0x50] sm:$0xff]  ;;  %v464_v35 = vpack.c.bf16 %v114_v32, %v112_v30  ;;  %v117_v36 = vld [vmem:[#allocation8 + $0x68] sm:$0xff]  ;;  %v119_v37 = vld [vmem:[#allocation8 + $0x78] sm:$0xff] }
  0x75   :  { %461 = vmatpush1.bf16.msra.mxu1 %v460_v22  ;;  %v150_v38 = vld [vmem:[#allocation10 + $0x68] sm:$0xff]  ;;  %v448_v39 = vpack.c.bf16 %v147_v34, %v145_v33  ;;  %v466_v40 = vpack.c.bf16 %v119_v37, %v117_v36  ;;  %v152_v41 = vld [vmem:[#allocation10 + $0x78] sm:$0xff]  ;;  %v116_v42 = vld [vmem:[#allocation8 + $0x60] sm:$0xff] }
  0x76   :  { %445 = vmatpush1.bf16.msra.mxu0 %v444_v26  ;;  %463 = vmatprep.subr.bf16.mxu1 %v462_v27  ;;  %v118_v43 = vld [vmem:[#allocation8 + $0x70] sm:$0xff]  ;;  %v450_v44 = vpack.c.bf16 %v152_v41, %v150_v38  ;;  %v149_v45 = vld [vmem:[#allocation10 + $0x60] sm:$0xff]  ;;  %v121_v47 = vld [vmem:[#allocation8 + $0x88] sm:$0xff]  ;;  %v394_v38 = vlaneseq }
  0x77   :  { %447 = vmatprep.subr.bf16.mxu0 %v446_v31  ;;  %v151_v46 = vld [vmem:[#allocation10 + $0x70] sm:$0xff]  ;;  %v123_v48 = vld [vmem:[#allocation8 + $0x98] sm:$0xff]  ;;  %v468_v49 = vpack.c.bf16 %v118_v43, %v116_v42  ;;  %v301_v50 = vld [vmem:[#allocation11 + $0x8] sm:$0xff] }
  0x78   :  { %v303_v51 = vld [vmem:[#allocation11 + $0x18] sm:$0xff]  ;;  %v452_v52 = vpack.c.bf16 %v151_v46, %v149_v45  ;;  %v470_v53 = vpack.c.bf16 %v123_v48, %v121_v47  ;;  %v120_v54 = vld [vmem:[#allocation8 + $0x80] sm:$0xff]  ;;  %v122_v55 = vld [vmem:[#allocation8 + $0x90] sm:$0xff] }
  0x79   :  { %465 = vmatpush1.bf16.msra.mxu1 %v464_v35  ;;  %v300_v56 = vld [vmem:[#allocation11] sm:$0xff]  ;;  %v486_v57 = vpack.c.bf16 %v303_v51, %v301_v50  ;;  %v302_v58 = vld [vmem:[#allocation11 + $0x10] sm:$0xff]  ;;  %v125_v59 = vld [vmem:[#allocation8 + $0xa8] sm:$0xff]  ;;  %v472_v63 = vpack.c.bf16 %v122_v55, %v120_v54 }
  0x7a   :  { %449 = vmatpush1.bf16.msra.mxu0 %v448_v39  ;;  %467 = vmatprep.subr.bf16.mxu1 %v466_v40  ;;  %v127_v60 = vld [vmem:[#allocation8 + $0xb8] sm:$0xff]  ;;  %v305_v61 = vld [vmem:[#allocation11 + $0x28] sm:$0xff]  ;;  %v136_v1 = vld [vmem:[#allocation5] sm:$0xff]  ;;  %v488_v2 = vpack.c.bf16 %v302_v58, %v300_v56  ;;  %v395_v39 = vshrl.u32 %v394_v38, 7 }
  0x7b   :  { %451 = vmatprep.subr.bf16.mxu0 %v450_v44  ;;  %v307_v62 = vld [vmem:[#allocation11 + $0x38] sm:$0xff]  ;;  %v474_v3 = vpack.c.bf16 %v127_v60, %v125_v59  ;;  %v124_v4 = vld [vmem:[#allocation8 + $0xa0] sm:$0xff]  ;;  %v126_v5 = vld [vmem:[#allocation8 + $0xb0] sm:$0xff] }
  0x7c   :  { %v304_v6 = vld [vmem:[#allocation11 + $0x20] sm:$0xff]  ;;  %v490_v7 = vpack.c.bf16 %v307_v62, %v305_v61  ;;  %v306_v8 = vld [vmem:[#allocation11 + $0x30] sm:$0xff]  ;;  %v129_v9 = vld [vmem:[#allocation8 + $0xc8] sm:$0xff]  ;;  %v476_v13 = vpack.c.bf16 %v126_v5, %v124_v4  ;;  %v400_v40 = vsub.s32 1, %v395_v39 }
  0x7d   :  { %469 = vmatpush1.bf16.msra.mxu1 %v468_v49  ;;  %v131_v10 = vld [vmem:[#allocation8 + $0xd8] sm:$0xff]  ;;  %v309_v11 = vld [vmem:[#allocation11 + $0x48] sm:$0xff]  ;;  %v492_v14 = vpack.c.bf16 %v306_v8, %v304_v6  ;;  %v128_v16 = vld [vmem:[#allocation8 + $0xc0] sm:$0xff] }
  0x7e   :  { %453 = vmatpush1.bf16.msra.mxu0 %v452_v52  ;;  %471 = vmatprep.subr.bf16.mxu1 %v470_v53  ;;  %v311_v12 = vld [vmem:[#allocation11 + $0x58] sm:$0xff]  ;;  %v478_v15 = vpack.c.bf16 %v131_v10, %v129_v9  ;;  %v130_v17 = vld [vmem:[#allocation8 + $0xd0] sm:$0xff]  ;;  %v308_v18 = vld [vmem:[#allocation11 + $0x40] sm:$0xff]  ;;  %v396_v52 = vsub.s32 0, %v395_v39 }
  0x7f   :  { %487 = vmatprep.subr.bf16.mxu0 %v486_v57  ;;  %v494_v19 = vpack.c.bf16 %v311_v12, %v309_v11  ;;  %v310_v20 = vld [vmem:[#allocation11 + $0x50] sm:$0xff]  ;;  %v133_v21 = vld [vmem:[#allocation8 + $0xe8] sm:$0xff]  ;;  %v135_v22 = vld [vmem:[#allocation8 + $0xf8] sm:$0xff]  ;;  %v480_v25 = vpack.c.bf16 %v130_v17, %v128_v16 }
  0x80   :  { %v313_v23 = vld [vmem:[#allocation11 + $0x68] sm:$0xff]  ;;  %v315_v24 = vld [vmem:[#allocation11 + $0x78] sm:$0xff]  ;;  %v496_v26 = vpack.c.bf16 %v310_v20, %v308_v18  ;;  %v482_v27 = vpack.c.bf16 %v135_v22, %v133_v21  ;;  %v132_v28 = vld [vmem:[#allocation8 + $0xe0] sm:$0xff] }
  0x81   :  { %473 = vmatpush1.bf16.msra.mxu1 %v472_v63  ;;  %435 = vmatmul.mubr.msk.f32.vlgmr.msra.gmra.mrb[0].mxu0 %vm153_vm0, %v136_v1  ;;  %v134_v29 = vld [vmem:[#allocation8 + $0xf0] sm:$0xff]  ;;  %v498_v30 = vpack.c.bf16 %v315_v24, %v313_v23  ;;  %v312_v31 = vld [vmem:[#allocation11 + $0x60] sm:$0xff]  ;;  %v299_v35 = vld [vmem:[#allocation7] sm:$0xff] }
  0x82   :  { %489 = vmatpush1.bf16.msra.mxu0 %v488_v2  ;;  %475 = vmatprep.subr.bf16.mxu1 %v474_v3  ;;  %v314_v32 = vld [vmem:[#allocation11 + $0x70] sm:$0xff]  ;;  %v484_v33 = vpack.c.bf16 %v134_v29, %v132_v28  ;;  %v392_v41 = vld [vmem:[%s857_s6] sm:$0x3]  ;;  %s695_s6 = smov [#allocation13]  }
  0x83   :  { %491 = vmatprep.subr.bf16.mxu0 %v490_v7  ;;  %383 = vmatprep.mubr.f32.mxu0 %v694_v0  ;;  %v500_v34 = vpack.c.bf16 %v314_v32, %v312_v31  ;;  %v103_v0 = vld [vmem:[#allocation2] sm:$0xff]  ;;  %v401_v48 = vrot.slane %v392_v41, %v400_v40  ;;  %v397_v54 = vrot.slane %v392_v41, %v396_v52  ;;  %s423_s23 = sshll.u32 %s695_s6, 4  ;;  %s424_s23 = int_to_ptr.vmem [resolvable:$true] %s423_s23 }
  0x84   :  { %s654_s0 = scalar_lea.vmem %s424_s23, 128  ;;  %p659_p7 = scmp.lt.s32.totalorder %s424_s23, %s424_s23 }
  0x85   :  { %477 = vmatpush1.bf16.msra.mxu1 %v476_v13  ;;  %p655_p6 = scmp.ne.s32.totalorder %s424_s23, %s654_s0  ;;  %p660_p8 = scmp.lt.s32.totalorder %s654_s0, %s654_s0 }
  0x86   :  { %493 = vmatpush1.bf16.msra.mxu0 %v492_v14  ;;  %479 = vmatprep.subr.bf16.mxu1 %v478_v15 }
  0x87   :  { %495 = vmatprep.subr.bf16.mxu0 %v494_v19  ;;  %p661_p9 = por %p660_p8, %p659_p7 }
  0x89   :  { %481 = vmatpush1.bf16.msra.mxu1 %v480_v25  ;;  %p662_p10 = pnand %p661_p9, %p655_p6 }
  0x8a   :  { %497 = vmatpush1.bf16.msra.mxu0 %v496_v26  ;;  %483 = vmatprep.subr.bf16.mxu1 %v482_v27 }
  0x8b   :  { %499 = vmatprep.subr.bf16.mxu0 %v498_v30 }
  0x8d   :  { %485 = vmatpush1.bf16.msra.mxu1 %v484_v33 }
  0x8e   :  { %501 = vmatpush1.bf16.msra.mxu0 %v500_v34 }
  0x90   :  { %293 = vmatmul.mubr.f32.vlgmr.msra.gmra.mrb[0].mxu1 %v103_v0 }
  0x91   :  { %436 = vmatmul.mubr.msk.f32.vlgmr.msra.gmra.mrb[2].mxu0 %vm153_vm0, %v299_v35 }
 0x154   :  { %v223_v36 = vpop.f32.mrb[0].mxu0 }
 0x155   :  { %v225_v37 = vpop.f32.mrb[1].mxu0 }
 0x163   :  { %v294_v42 = vpop.f32.mrb[0].mxu1 }
 0x164   :  { %v295_v43 = vadd.f32 %v294_v42, %v223_v36  ;;  %v296_v44 = vpop.f32.mrb[1].mxu1  ;;  %v385_v45 = vpop.f32.mrb[2].mxu0 }
 0x165   :  { %v297_v46 = vadd.f32 %v296_v44, %v225_v37  ;;  %v387_v47 = vpop.f32.mrb[3].mxu0 }
 0x166   :  { %v390_v49 = vadd.f32 %v385_v45, %v295_v43 }
 0x167   :  { %v391_v50 = vadd.f32 %v387_v47, %v297_v46 }
 0x168   :  { %v404_v55 = vadd.f32 %v397_v54, %v390_v49 }
 0x169   :  { %v405_v51 = vadd.f32 %v401_v48, %v391_v50 }
 0x16b   :  { %v437_v53 = vmul.f32 -1.442695, %v405_v51 }
 0x16d   :  { %516 = vpow2.f32 %v437_v53 }
 0x16e   :  { %518 = vtanh.f32 %v404_v55 }
 0x177   :  { %v517_v56 = vpop.eup %516 }
 0x178   :  { %v410_v57 = vadd.f32 1.0, %v517_v56  ;;  %v519_v58 = vpop.eup %518 }
 0x179   :  { %v413_v59 = vsub.f32 %v519_v58, %v103_v0 }
 0x17a   :  { %520 = vrcp.f32 %v410_v57 }
 0x184   :  { %v521_v60 = vpop.eup %520 }
 0x185   :  { %v414_v61 = vmul.f32 %v521_v60, %v413_v59 }
 0x187   :  { %v415_v62 = vadd.f32 %v414_v61, %v103_v0 }
 0x189   :  { %416 = vst [vmem:[#allocation13] sm:$0xff] %v415_v62 }
 0x18a   :  { %665 = shalt.err (!%p662_p10)
}
 0x18b   :  { %s666_s28 = scalar_lea.hbm %s858_s7, 128 }
 0x18c   :  { %p667_p11 = scmp.ne.s32.totalorder %s858_s7, %s666_s28  ;;  %p670_p12 = scmp.lt.u32.totalorder %s666_s28, %s858_s7 }
 0x18e   :  { %p672_p13 = pnand %p670_p12, %p667_p11 }
 0x190   :  { %675 = shalt.err (!%p672_p13)
}
 0x191   :  { %426 = dma.vmem_to_hbm [thread:$0]  %s424_s23, 128, %s858_s7, [#allocation4]  }
 0x192   :  { %684 = dma.done.wait [#allocation4], 128  }
 0x193   :  { %685 = vsyncadd [#allocation4], 4294967168 }
 0x194   :  { %430 = vsyncpa [#allocation3], 1 }
 0x195   :  { %431 = vsyncpa [#allocation6], 1 }
 0x196   :  { %432 = vsyncpa [#allocation9], 1 }
 0x197   :  { %433 = vsyncpa [#allocation12], 1 }
 0x198   :  { %434 = vsyncpa [#allocation4], 1 }

</bundles_post_ra>
